<compile_context>
chip_gen: v6e
topology: v6e:2x2x1
jax: 0.10.0
libtpu: 0.0.40
codegen_flags: <defaults>
</compile_context>

<pallas_src>
import functools

import jax
import jax.numpy as jnp
from jax.experimental import pallas as pl
from jax.experimental.pallas import tpu as pltpu

_LANE = 128
_MIB = 1024 * 1024


def _round_up(x, m):
    return ((x + m - 1) // m) * m


def _pad2d(arr, rows, cols, dtype):
    out = jnp.zeros((rows, cols), jnp.float32)
    out = out.at[: arr.shape[0], : arr.shape[1]].set(arr.astype(jnp.float32))
    return out.astype(dtype)


def _pick_tile(n_pad, candidates):
    for c in candidates:
        if n_pad % c == 0:
            return c
    return _LANE  # n_pad is always a multiple of 128


@functools.lru_cache(maxsize=None)
def _vmem_budgets():
    """(fused_cutover_bytes, fused_vmem_limit, tiled_vmem_limit), per chip gen."""
    phys = None
    try:
        phys = int(pltpu.get_tpu_info().vmem_capacity_bytes)
    except Exception:
        phys = None
    if phys is not None and phys >= 96 * _MIB:
        # v5e / v6e: 128 MiB physical VMEM -> keep the single-A-read fused
        # path for much larger graphs instead of the 2x-A-traffic tiled path.
        return 80 * _MIB, 100 * _MIB, 100 * _MIB
    # v7x (64 MiB physical) or unknown: stay conservative, hit tiled earlier.
    return 26 * _MIB, 44 * _MIB, 44 * _MIB


# --------------------------------------------------------------------------
# Fused two-layer kernel: out = A @ ((relu(A @ (X W1) + b1)) W2) + b2
# Whole (padded) graph resident in VMEM; h kept as a value (no scratch
# store/reload), f32 accumulation everywhere, bf16 MXU feeds.
# --------------------------------------------------------------------------
def _gcn_fused_kernel(a_ref, x_ref, w1_ref, b1_ref, w2_ref, b2_ref, o_ref):
    # ---- layer 1 ----
    xw = jnp.dot(x_ref[...], w1_ref[...], preferred_element_type=jnp.float32)
    h = jnp.dot(a_ref[...], xw.astype(jnp.bfloat16),
                preferred_element_type=jnp.float32)
    h = jnp.maximum(h + b1_ref[...], 0.0)          # f32 epilogue (VPU)
    # ---- layer 2 (h stays a value; no vst+vld round trip) ----
    hw = jnp.dot(h.astype(jnp.bfloat16), w2_ref[...],
                 preferred_element_type=jnp.float32)
    out = jnp.dot(a_ref[...], hw.astype(jnp.bfloat16),
                  preferred_element_type=jnp.float32)
    o_ref[...] = (out + b2_ref[...]).astype(o_ref.dtype)


def gcn_fused_pallas(a_pad, x_pad, w1_pad, b1_pad, w2_pad, b2_pad, *, vmem_limit):
    n_pad = a_pad.shape[0]
    f_pad = x_pad.shape[1]
    h_pad = w1_pad.shape[1]
    vmem = pl.BlockSpec(memory_space=pltpu.MemorySpace.VMEM)
    flops = int(2 * n_pad * f_pad * h_pad + 2 * n_pad * h_pad * h_pad
                + 4 * n_pad * n_pad * h_pad)
    bytes_accessed = int(2 * a_pad.size + 2 * x_pad.size + 2 * w1_pad.size
                         + 2 * w2_pad.size + 4 * (b1_pad.size + b2_pad.size)
                         + 4 * n_pad * h_pad)
    return pl.pallas_call(
        _gcn_fused_kernel,
        out_shape=jax.ShapeDtypeStruct((n_pad, h_pad), jnp.float32),
        in_specs=[vmem] * 6,
        out_specs=vmem,
        compiler_params=pltpu.CompilerParams(vmem_limit_bytes=int(vmem_limit)),
        cost_estimate=pl.CostEstimate(flops=flops, transcendentals=0,
                                      bytes_accessed=bytes_accessed),
    )(a_pad, x_pad, w1_pad, b1_pad, w2_pad, b2_pad)


# --------------------------------------------------------------------------
# Tiled kernel for large graphs.
#   grid = (row blocks, k reduction blocks)
#   A     : (tm, tk) blocks, pipelined                 (the binding HBM stream)
#   XW    : full-array VMEM-resident (DMA'd once), sliced in-kernel with pl.ds
#   bias  : resident
#   W2    : resident (only when fuse_w2)
# Finalize (last k): out = [relu](acc + b)  [@ W2 if fuse_w2]
# --------------------------------------------------------------------------
def _gcn_tiled_kernel(a_ref, xw_ref, b_ref, *rest, tk, apply_relu, fuse_w2):
    if fuse_w2:
        w2_ref, o_ref, acc_ref = rest
    else:
        o_ref, acc_ref = rest

    k = pl.program_id(1)

    @pl.when(k == 0)
    def _():
        acc_ref[...] = jnp.zeros_like(acc_ref)

    ks = pl.multiple_of(k * tk, tk)
    acc_ref[...] += jnp.dot(a_ref[...], xw_ref[pl.ds(ks, tk), :],
                            preferred_element_type=jnp.float32)

    @pl.when(k == pl.num_programs(1) - 1)
    def _():
        out = acc_ref[...] + b_ref[...]
        if apply_relu:
            out = jnp.maximum(out, 0.0)
        if fuse_w2:
            out = jnp.dot(out.astype(jnp.bfloat16), w2_ref[...],
                          preferred_element_type=jnp.float32)
        o_ref[...] = out.astype(o_ref.dtype)


def gcn_conv_tiled(a_pad, xw_pad, b_pad, w2_pad=None, *, apply_relu, fuse_w2,
                   out_dtype, vmem_limit):
    n_pad = a_pad.shape[0]
    h_pad = xw_pad.shape[1]
    tm = _pick_tile(n_pad, (512, 256, 128))
    tk = _pick_tile(n_pad, (2048, 1024, 512, 256, 128))
    grid = (n_pad // tm, n_pad // tk)

    in_specs = [
        pl.BlockSpec((tm, tk), lambda i, k: (i, k)),            # A tiles (pipelined)
        pl.BlockSpec((n_pad, h_pad), lambda i, k: (0, 0)),      # XW resident
        pl.BlockSpec((1, h_pad), lambda i, k: (0, 0)),          # bias resident
    ]
    operands = [a_pad, xw_pad, b_pad]
    if fuse_w2:
        in_specs.append(pl.BlockSpec((h_pad, h_pad), lambda i, k: (0, 0)))
        operands.append(w2_pad)

    flops = int(2 * n_pad * n_pad * h_pad)
    if fuse_w2:
        flops += int(2 * n_pad * h_pad * h_pad)
    bytes_accessed = int(2 * a_pad.size + 2 * xw_pad.size + 4 * b_pad.size
                         + (2 * w2_pad.size if fuse_w2 else 0)
                         + jnp.dtype(out_dtype).itemsize * n_pad * h_pad)

    kernel = functools.partial(_gcn_tiled_kernel, tk=tk,
                               apply_relu=apply_relu, fuse_w2=fuse_w2)
    return pl.pallas_call(
        kernel,
        out_shape=jax.ShapeDtypeStruct((n_pad, h_pad), out_dtype),
        grid_spec=pltpu.PrefetchScalarGridSpec(
            num_scalar_prefetch=0,
            grid=grid,
            in_specs=in_specs,
            out_specs=pl.BlockSpec((tm, h_pad), lambda i, k: (i, 0)),
            scratch_shapes=[pltpu.VMEM((tm, h_pad), jnp.float32)],
        ),
        compiler_params=pltpu.CompilerParams(
            dimension_semantics=("parallel", "arbitrary"),
            vmem_limit_bytes=int(vmem_limit)),
        cost_estimate=pl.CostEstimate(flops=flops, transcendentals=0,
                                      bytes_accessed=bytes_accessed),
    )(*operands)


# --------------------------------------------------------------------------
# Glue: dense normalized adjacency (PyG gcn_norm semantics: scatter-add of
# duplicate edges, self-loops only added where missing).
# --------------------------------------------------------------------------
def normalized_adjacency(edge_index, num_nodes):
    src, dst = edge_index[0], edge_index[1]
    a = jnp.zeros((num_nodes, num_nodes), jnp.float32).at[dst, src].add(1.0)
    diag = jnp.diagonal(a)
    a = a + jnp.diag(jnp.where(diag == 0.0, 1.0, 0.0))  # add_remaining_self_loops
    deg = jnp.sum(a, axis=1)
    d_inv_sqrt = jnp.where(deg > 0, jax.lax.rsqrt(deg), 0.0)
    return d_inv_sqrt[:, None] * a * d_inv_sqrt[None, :]


def build_padded_adjacency(edge_index, num_nodes):
    """Precompute once per graph (hoisted out of the per-forward path).

    A_hat is stored in bf16 (MXU feed); for very high-degree graphs consider
    keeping it f32 and re-validating.
    """
    n_pad = _round_up(num_nodes, _LANE)
    a_hat = normalized_adjacency(edge_index, num_nodes)
    return _pad2d(a_hat, n_pad, n_pad, jnp.bfloat16)


# --------------------------------------------------------------------------
# GCNEncoder forward
# --------------------------------------------------------------------------
def gcn_encoder_forward(params, x, a_hat_pad, *, force_tiled=False):
    n, f_in = x.shape
    h_dim = params["w1"].shape[1]
    n_pad = a_hat_pad.shape[0]
    f_pad = _round_up(f_in, _LANE)
    h_pad = _round_up(h_dim, _LANE)

    x_p = _pad2d(x, n_pad, f_pad, jnp.bfloat16)
    w1_p = _pad2d(params["w1"], f_pad, h_pad, jnp.bfloat16)
    w2_p = _pad2d(params["w2"], h_pad, h_pad, jnp.bfloat16)
    b1_p = _pad2d(params["b1"], 1, h_pad, jnp.float32)
    b2_p = _pad2d(params["b2"], 1, h_pad, jnp.float32)

    fused_cutover, fused_limit, tiled_limit = _vmem_budgets()

    # VMEM estimate for the whole-graph fused kernel, INCLUDING the f32
    # temporaries (xw / h / hw / out) the un-gridded kernel materializes.
    fused_vmem_bytes = (2 * a_hat_pad.size + 2 * x_p.size + 2 * w1_p.size
                        + 2 * w2_p.size + 4 * (b1_p.size + b2_p.size)
                        + 6 * n_pad * h_pad * 4     # f32 temporaries + slack
                        + 4 * n_pad * h_pad)        # f32 output
    use_fused = (not force_tiled) and fused_vmem_bytes <= fused_cutover

    if use_fused:
        out_p = gcn_fused_pallas(a_hat_pad, x_p, w1_p, b1_p, w2_p, b2_p,
                                 vmem_limit=fused_limit)
    else:
        # XW1 computed once (O(N*F*H), tiny vs O(N^2*H)); the two A-passes are
        # tiled, with W2 folded into layer-1's finalize so h never hits HBM.
        xw1 = jnp.dot(x_p, w1_p,
                      preferred_element_type=jnp.float32).astype(jnp.bfloat16)
        xw2 = gcn_conv_tiled(a_hat_pad, xw1, b1_p, w2_p,
                             apply_relu=True, fuse_w2=True,
                             out_dtype=jnp.bfloat16, vmem_limit=tiled_limit)
        out_p = gcn_conv_tiled(a_hat_pad, xw2, b2_p,
                               apply_relu=False, fuse_w2=False,
                               out_dtype=jnp.float32, vmem_limit=tiled_limit)

    return out_p[:n, :h_dim]


gcn_encoder_forward_jit = jax.jit(gcn_encoder_forward,
                                  static_argnames=("force_tiled",))


def init_params(key, input_dim, hidden_dim):
    k1, k2 = jax.random.split(key)

    def glorot(k, fan_in, fan_out):
        lim = jnp.sqrt(6.0 / (fan_in + fan_out))
        return jax.random.uniform(k, (fan_in, fan_out), jnp.float32, -lim, lim)

    return {
        "w1": glorot(k1, input_dim, hidden_dim),
        "b1": jnp.zeros((1, hidden_dim), jnp.float32),
        "w2": glorot(k2, hidden_dim, hidden_dim),
        "b2": jnp.zeros((1, hidden_dim), jnp.float32),
    }


# Pure-JAX references. bf16=True mirrors the kernel's numerics (bf16 MXU
# inputs, f32 accumulation / epilogue); bf16=False is the plain f32 model.
def gcn_encoder_ref(params, x, edge_index, *, bf16):
    cast = ((lambda t: t.astype(jnp.bfloat16).astype(jnp.float32))
            if bf16 else (lambda t: t))
    a = cast(normalized_adjacency(edge_index, x.shape[0]))
    xw1 = cast(cast(x) @ cast(params["w1"]))
    h = cast(jnp.maximum(a @ xw1 + params["b1"], 0.0))
    xw2 = cast(h @ cast(params["w2"]))
    return a @ xw2 + params["b2"]


if __name__ == "__main__":
    N, INPUT_DIM, HIDDEN_DIM, E = 64, 16, 32, 256
    key = jax.random.PRNGKey(0)
    kx, ke, kp = jax.random.split(key, 3)

    x = jax.random.normal(kx, (N, INPUT_DIM), jnp.float32)
    half = jax.random.randint(ke, (2, E // 2), 0, N, jnp.int32)
    edge_index = jnp.concatenate([half, half[::-1]], axis=1)
    params = init_params(kp, INPUT_DIM, HIDDEN_DIM)

    # --- small graph: fused whole-graph-in-VMEM path ---
    a_pad = build_padded_adjacency(edge_index, N)
    out = jax.block_until_ready(gcn_encoder_forward_jit(params, x, a_pad))
    assert out.shape == (N, HIDDEN_DIM)

    ref_bf = gcn_encoder_ref(params, x, edge_index, bf16=True)
    ref_f32 = gcn_encoder_ref(params, x, edge_index, bf16=False)
    assert jnp.allclose(out, ref_bf, atol=2e-3, rtol=2e-3), "mismatch vs bf16 ref"
    assert jnp.allclose(out, ref_f32, atol=2e-2, rtol=2e-2), "mismatch vs f32 ref"

    # --- same graph through the tiled path (forced) ---
    out_t = jax.block_until_ready(
        gcn_encoder_forward_jit(params, x, a_pad, force_tiled=True))
    assert jnp.allclose(out_t, ref_bf, atol=2e-3, rtol=2e-3), "tiled mismatch"

    # --- larger graph: exercises the multi-block accumulator grid ---
    N2, E2 = 320, 2048
    kx2, ke2 = jax.random.split(jax.random.PRNGKey(1))
    x2 = jax.random.normal(kx2, (N2, INPUT_DIM), jnp.float32)
    half2 = jax.random.randint(ke2, (2, E2 // 2), 0, N2, jnp.int32)
    edge_index2 = jnp.concatenate([half2, half2[::-1]], axis=1)
    a2_pad = build_padded_adjacency(edge_index2, N2)

    out2_fused = gcn_encoder_forward_jit(params, x2, a2_pad)
    out2_tiled = gcn_encoder_forward_jit(params, x2, a2_pad, force_tiled=True)
    jax.block_until_ready((out2_fused, out2_tiled))
    ref2 = gcn_encoder_ref(params, x2, edge_index2, bf16=True)
    assert jnp.allclose(out2_fused, ref2, atol=2e-3, rtol=2e-3), "fused N=320 mismatch"
    assert jnp.allclose(out2_tiled, ref2, atol=2e-3, rtol=2e-3), "tiled N=320 mismatch"

    print("KERNEL_OK")
</pallas_src>

<mosaic_0001>
module attributes {stable_mosaic.version = 11 : i64} {
  func.func @_gcn_fused_kernel(%arg0: memref<128x128xbf16, #tpu.memory_space<vmem>>, %arg1: memref<128x128xbf16, #tpu.memory_space<vmem>>, %arg2: memref<128x128xbf16, #tpu.memory_space<vmem>>, %arg3: memref<1x128xf32, #tpu.memory_space<vmem>>, %arg4: memref<128x128xbf16, #tpu.memory_space<vmem>>, %arg5: memref<1x128xf32, #tpu.memory_space<vmem>>, %arg6: memref<128x128xf32, #tpu.memory_space<vmem>>) attributes {dimension_semantics = [], scalar_prefetch = 0 : i64, scratch_operands = 0 : i64, tpu.core_type = #tpu.core_type<tc>} {
    %c0 = arith.constant 0 : index
    %c0_0 = arith.constant 0 : index
    %0 = vector.load %arg1[%c0, %c0_0] : memref<128x128xbf16, #tpu.memory_space<vmem>>, vector<128x128xbf16>
    %c0_1 = arith.constant 0 : index
    %c0_2 = arith.constant 0 : index
    %1 = vector.load %arg2[%c0_1, %c0_2] : memref<128x128xbf16, #tpu.memory_space<vmem>>, vector<128x128xbf16>
    %cst = arith.constant dense<0.000000e+00> : vector<128x128xf32>
    %2 = tpu.matmul %0, %1, %cst {dimension_numbers = #tpu.dot_dimension_numbers<[1], [0], [0], [1], [0, 0, 1, 1], [], []>} : vector<128x128xbf16>, vector<128x128xbf16>, vector<128x128xf32> -> vector<128x128xf32>
    %c0_3 = arith.constant 0 : index
    %c0_4 = arith.constant 0 : index
    %3 = vector.load %arg0[%c0_3, %c0_4] : memref<128x128xbf16, #tpu.memory_space<vmem>>, vector<128x128xbf16>
    %4 = arith.truncf %2 : vector<128x128xf32> to vector<128x128xbf16>
    %cst_5 = arith.constant dense<0.000000e+00> : vector<128x128xf32>
    %5 = tpu.matmul %3, %4, %cst_5 {dimension_numbers = #tpu.dot_dimension_numbers<[1], [0], [0], [1], [0, 0, 1, 1], [], []>} : vector<128x128xbf16>, vector<128x128xbf16>, vector<128x128xf32> -> vector<128x128xf32>
    %c0_6 = arith.constant 0 : index
    %c0_7 = arith.constant 0 : index
    %6 = vector.load %arg3[%c0_6, %c0_7] : memref<1x128xf32, #tpu.memory_space<vmem>>, vector<1x128xf32>
    %7 = vector.broadcast %6 : vector<1x128xf32> to vector<128x128xf32>
    %8 = arith.addf %5, %7 : vector<128x128xf32>
    %cst_8 = arith.constant 0.000000e+00 : f32
    %9 = vector.broadcast %cst_8 : f32 to vector<128x128xf32>
    %10 = arith.maximumf %8, %9 : vector<128x128xf32>
    %11 = arith.truncf %10 : vector<128x128xf32> to vector<128x128xbf16>
    %c0_9 = arith.constant 0 : index
    %c0_10 = arith.constant 0 : index
    %12 = vector.load %arg4[%c0_9, %c0_10] : memref<128x128xbf16, #tpu.memory_space<vmem>>, vector<128x128xbf16>
    %cst_11 = arith.constant dense<0.000000e+00> : vector<128x128xf32>
    %13 = tpu.matmul %11, %12, %cst_11 {dimension_numbers = #tpu.dot_dimension_numbers<[1], [0], [0], [1], [0, 0, 1, 1], [], []>} : vector<128x128xbf16>, vector<128x128xbf16>, vector<128x128xf32> -> vector<128x128xf32>
    %c0_12 = arith.constant 0 : index
    %c0_13 = arith.constant 0 : index
    %14 = vector.load %arg0[%c0_12, %c0_13] : memref<128x128xbf16, #tpu.memory_space<vmem>>, vector<128x128xbf16>
    %15 = arith.truncf %13 : vector<128x128xf32> to vector<128x128xbf16>
    %cst_14 = arith.constant dense<0.000000e+00> : vector<128x128xf32>
    %16 = tpu.matmul %14, %15, %cst_14 {dimension_numbers = #tpu.dot_dimension_numbers<[1], [0], [0], [1], [0, 0, 1, 1], [], []>} : vector<128x128xbf16>, vector<128x128xbf16>, vector<128x128xf32> -> vector<128x128xf32>
    %c0_15 = arith.constant 0 : index
    %c0_16 = arith.constant 0 : index
    %17 = vector.load %arg5[%c0_15, %c0_16] : memref<1x128xf32, #tpu.memory_space<vmem>>, vector<1x128xf32>
    %18 = vector.broadcast %17 : vector<1x128xf32> to vector<128x128xf32>
    %19 = arith.addf %16, %18 : vector<128x128xf32>
    %c0_17 = arith.constant 0 : index
    %c0_18 = arith.constant 0 : index
    %20 = vector.load %arg6[%c0_17, %c0_18] : memref<128x128xf32, #tpu.memory_space<vmem>>, vector<128x128xf32>
    tpu.vector_store %arg6[%c0_17, %c0_18], %19 {strides = array<i32>} : memref<128x128xf32, #tpu.memory_space<vmem>>, vector<128x128xf32>,
    return
  }
}

</mosaic_0001>

<bundles_post_ra>
// kernel: gcn_encoder_forward.1
= control target key start
LH: loop header
LB: loop body
LE: loop exit
PB: predicated region body
PF: predicated region fallthrough
CT: control target
= control target key end

     0   :  { %s1217_s2 = inlined_call_operand.vmem [shape: bf16[128,128], index: 2, kind: input, shape index: {}]   ;;  %s1218_s1 = inlined_call_operand.vmem [shape: bf16[128,128], index: 1, kind: input, shape index: {}]   ;;  %s1219_s0 = inlined_call_operand.vmem [shape: bf16[128,128], index: 0, kind: input, shape index: {}]   ;;  %s1220_s4 = inlined_call_operand.vmem [shape: bf16[128,128], index: 4, kind: input, shape index: {}]   ;;  %s1221_s3 = inlined_call_operand.vmem [shape: f32[1,128], index: 3, kind: input, shape index: {}]   ;;  %s1222_s5 = inlined_call_operand.vmem [shape: f32[1,128], index: 5, kind: input, shape index: {}]   ;;  %s1223_s6 = inlined_call_operand.vmem [shape: f32[128,128], index: 6, kind: output, shape index: {}]  }
   0x1   :  { %v968_v0 = vld [vmem:[%s1217_s2 + $0x38] sm:$0xff]   ;;  %v969_v1 = vld [vmem:[%s1217_s2 + $0x30] sm:$0xff]   ;;  %v970_v2 = vld [vmem:[%s1217_s2 + $0x28] sm:$0xff]  }
   0x2   :  { %840 = vmatprep.subr.bf16.mxu0 %v968_v0  ;;  %v971_v3 = vld [vmem:[%s1217_s2 + $0x20] sm:$0xff]   ;;  %v972_v5 = vld [vmem:[%s1217_s2 + $0x18] sm:$0xff]   ;;  %v973_v6 = vld [vmem:[%s1217_s2 + $0x10] sm:$0xff]  }
   0x3   :  { %841 = vmatpush3.bf16.msra.mxu0 %v968_v0  ;;  %v976_v4 = vld [vmem:[%s1218_s1] sm:$0xff]   ;;  %v974_v7 = vld [vmem:[%s1217_s2 + $0x8] sm:$0xff]   ;;  %v978_v10 = vld [vmem:[%s1218_s1 + $0x10] sm:$0xff]  }
   0x4   :  { %842 = vmatprep.subr.bf16.mxu0 %v969_v1  ;;  %856 = vmatprep.mubr.bf16.mxu0 %v976_v4  ;;  %v975_v8 = vld [vmem:[%s1217_s2] sm:$0xff]   ;;  %v977_v9 = vld [vmem:[%s1218_s1 + $0x8] sm:$0xff]   ;;  %v979_v11 = vld [vmem:[%s1218_s1 + $0x18] sm:$0xff]  }
   0x5   :  { %v980_v12 = vld [vmem:[%s1218_s1 + $0x20] sm:$0xff]   ;;  %v981_v13 = vld [vmem:[%s1218_s1 + $0x28] sm:$0xff]   ;;  %v982_v14 = vld [vmem:[%s1218_s1 + $0x30] sm:$0xff]  }
   0x6   :  { %v983_v15 = vld [vmem:[%s1218_s1 + $0x38] sm:$0xff]   ;;  %v1086_v16 = vld [vmem:[%s1219_s0] sm:$0xff]   ;;  %v993_v18 = vld [vmem:[%s1220_s4 + $0x30] sm:$0xff]  }
   0x7   :  { %843 = vmatpush3.bf16.msra.mxu0 %v969_v1  ;;  %888 = vmatprep.mubr.bf16.mxu1 %v1086_v16  ;;  %v992_v17 = vld [vmem:[%s1220_s4 + $0x38] sm:$0xff]   ;;  %v994_v19 = vld [vmem:[%s1220_s4 + $0x28] sm:$0xff]   ;;  %v995_v20 = vld [vmem:[%s1220_s4 + $0x20] sm:$0xff]  }
   0x8   :  { %844 = vmatprep.subr.bf16.mxu0 %v970_v2  ;;  %v996_v21 = vld [vmem:[%s1220_s4 + $0x18] sm:$0xff]   ;;  %v1107_v46 = vld [vmem:[%s1219_s0 + $0x8] sm:$0xff]   ;;  %v1112_v47 = vld [vmem:[%s1219_s0 + $0x10] sm:$0xff]  }
   0x9   :  { %v1119_v48 = vld [vmem:[%s1219_s0 + $0x18] sm:$0xff]   ;;  %v1124_v49 = vld [vmem:[%s1219_s0 + $0x20] sm:$0xff]   ;;  %v1131_v50 = vld [vmem:[%s1219_s0 + $0x28] sm:$0xff]  }
   0xa   :  { %v1136_v51 = vld [vmem:[%s1219_s0 + $0x30] sm:$0xff]   ;;  %v1143_v52 = vld [vmem:[%s1219_s0 + $0x38] sm:$0xff]   ;;  %v998_v54 = vld [vmem:[%s1220_s4 + $0x8] sm:$0xff]  }
   0xb   :  { %845 = vmatpush3.bf16.msra.mxu0 %v970_v2  ;;  %v997_v53 = vld [vmem:[%s1220_s4 + $0x10] sm:$0xff]   ;;  %v999_v55 = vld [vmem:[%s1220_s4] sm:$0xff]  }
   0xc   :  { %846 = vmatprep.subr.bf16.mxu0 %v971_v3  ;;  %v758_v58 = vld [vmem:[%s1221_s3] ss:$0 sm:$0xff] }
   0xf   :  { %847 = vmatpush3.bf16.msra.mxu0 %v971_v3 }
  0x10   :  { %848 = vmatprep.subr.bf16.mxu0 %v972_v5 }
  0x13   :  { %849 = vmatpush3.bf16.msra.mxu0 %v972_v5 }
  0x14   :  { %850 = vmatprep.subr.bf16.mxu0 %v973_v6 }
  0x17   :  { %851 = vmatpush3.bf16.msra.mxu0 %v973_v6 }
  0x18   :  { %852 = vmatprep.subr.bf16.mxu0 %v974_v7 }
  0x1b   :  { %853 = vmatpush3.bf16.msra.mxu0 %v974_v7 }
  0x1c   :  { %854 = vmatprep.subr.bf16.mxu0 %v975_v8 }
  0x1f   :  { %855 = vmatpush3.bf16.msra.mxu0 %v975_v8 }
  0x20   :  { %904 = vmatprep.subr.bf16.mxu0 %v992_v17 }
  0x22   :  { %857 = vmatmul.mubr.bf16.vlgmr.msra.gmra.mxu0 %v977_v9 }
  0x23   :  { %860 = vmatprep.mubr.bf16.mxu0 %v978_v10  ;;  %905 = vmatpush3.bf16.msra.mxu0 %v992_v17 }
  0x24   :  { %906 = vmatprep.subr.bf16.mxu0 %v993_v18 }
  0x27   :  { %907 = vmatpush3.bf16.msra.mxu0 %v993_v18 }
  0x28   :  { %908 = vmatprep.subr.bf16.mxu0 %v994_v19 }
  0x2a   :  { %861 = vmatmul.mubr.bf16.gmra.mxu0 %v979_v11 }
  0x2b   :  { %864 = vmatprep.mubr.bf16.mxu0 %v980_v12  ;;  %909 = vmatpush3.bf16.msra.mxu0 %v994_v19 }
  0x2c   :  { %910 = vmatprep.subr.bf16.mxu0 %v995_v20 }
  0x2f   :  { %911 = vmatpush3.bf16.msra.mxu0 %v995_v20 }
  0x30   :  { %912 = vmatprep.subr.bf16.mxu0 %v996_v21 }
  0x32   :  { %865 = vmatmul.mubr.bf16.gmra.mxu0 %v981_v13 }
  0x33   :  { %868 = vmatprep.mubr.bf16.mxu0 %v982_v14  ;;  %913 = vmatpush3.bf16.msra.mxu0 %v996_v21 }
  0x34   :  { %914 = vmatprep.subr.bf16.mxu0 %v997_v53 }
  0x37   :  { %915 = vmatpush3.bf16.msra.mxu0 %v997_v53 }
  0x38   :  { %916 = vmatprep.subr.bf16.mxu0 %v998_v54 }
  0x3a   :  { %869 = vmatmul.mubr.bf16.gmra.mxu0 %v983_v15 }
  0x3b   :  { %917 = vmatpush3.bf16.msra.mxu0 %v998_v54 }
  0x3c   :  { %918 = vmatprep.subr.bf16.mxu0 %v999_v55 }
  0x3f   :  { %919 = vmatpush3.bf16.msra.mxu0 %v999_v55 }
  0xe2   :  { %v858_v22 = vpop.f32.mrf.mxu0 }
  0xe4   :  { %v186_v23 = vpop.f32.mrf.mxu0 }
  0xe6   :  { %v859_v24 = vpop.f32.mrf.mxu0 }
  0xe7   :  { %v266_v44 = vpack.c.bf16 %v859_v24, %v858_v22 }
  0xe8   :  { %v189_v25 = vpop.f32.mrf.mxu0 }
  0xe9   :  { %v265_v45 = vpack.c.bf16 %v189_v25, %v186_v23 }
  0xea   :  { %v862_v26 = vpop.f32.mrf.mxu0 }
  0xec   :  { %v202_v27 = vpop.f32.mrf.mxu0 }
  0xee   :  { %v863_v28 = vpop.f32.mrf.mxu0 }
  0xef   :  { %v268_v42 = vpack.c.bf16 %v863_v28, %v862_v26 }
  0xf0   :  { %v205_v29 = vpop.f32.mrf.mxu0 }
  0xf1   :  { %v267_v43 = vpack.c.bf16 %v205_v29, %v202_v27 }
  0xf2   :  { %v866_v30 = vpop.f32.mrf.mxu0 }
  0xf4   :  { %v218_v31 = vpop.f32.mrf.mxu0 }
  0xf6   :  { %v867_v32 = vpop.f32.mrf.mxu0 }
  0xf7   :  { %v270_v40 = vpack.c.bf16 %v867_v32, %v866_v30 }
  0xf8   :  { %v221_v33 = vpop.f32.mrf.mxu0 }
  0xf9   :  { %v269_v41 = vpack.c.bf16 %v221_v33, %v218_v31 }
  0xfa   :  { %v870_v34 = vpop.f32.mrf.mxu0 }
  0xfc   :  { %v234_v35 = vpop.f32.mrf.mxu0 }
  0xfe   :  { %v871_v36 = vpop.f32.mrf.mxu0 }
  0xff   :  { %v272_v37 = vpack.c.bf16 %v871_v36, %v870_v34 }
 0x100   :  { %v237_v38 = vpop.f32.mrf.mxu0 }
 0x101   :  { %v271_v39 = vpack.c.bf16 %v237_v38, %v234_v35  ;;  %872 = vmatprep.subr.bf16.mxu1 %v272_v37 }
 0x102   :  { %873 = vmatpush3.bf16.msra.mxu1 %v272_v37 }
 0x103   :  { %874 = vmatprep.subr.bf16.mxu1 %v271_v39 }
 0x106   :  { %875 = vmatpush3.bf16.msra.mxu1 %v271_v39 }
 0x107   :  { %876 = vmatprep.subr.bf16.mxu1 %v270_v40 }
 0x10a   :  { %877 = vmatpush3.bf16.msra.mxu1 %v270_v40 }
 0x10b   :  { %878 = vmatprep.subr.bf16.mxu1 %v269_v41 }
 0x10e   :  { %879 = vmatpush3.bf16.msra.mxu1 %v269_v41 }
 0x10f   :  { %880 = vmatprep.subr.bf16.mxu1 %v268_v42 }
 0x112   :  { %881 = vmatpush3.bf16.msra.mxu1 %v268_v42 }
 0x113   :  { %882 = vmatprep.subr.bf16.mxu1 %v267_v43 }
 0x116   :  { %883 = vmatpush3.bf16.msra.mxu1 %v267_v43 }
 0x117   :  { %884 = vmatprep.subr.bf16.mxu1 %v266_v44 }
 0x11a   :  { %885 = vmatpush3.bf16.msra.mxu1 %v266_v44 }
 0x11b   :  { %886 = vmatprep.subr.bf16.mxu1 %v265_v45 }
 0x11e   :  { %887 = vmatpush3.bf16.msra.mxu1 %v265_v45 }
 0x121   :  { %889 = vmatmul.mubr.bf16.vlgmr.msra.gmra.mxu1 %v1107_v46 }
 0x122   :  { %892 = vmatprep.mubr.bf16.mxu1 %v1112_v47 }
 0x129   :  { %893 = vmatmul.mubr.bf16.gmra.mxu1 %v1119_v48 }
 0x12a   :  { %896 = vmatprep.mubr.bf16.mxu1 %v1124_v49 }
 0x131   :  { %897 = vmatmul.mubr.bf16.gmra.mxu1 %v1131_v50 }
 0x132   :  { %900 = vmatprep.mubr.bf16.mxu1 %v1136_v51 }
 0x139   :  { %901 = vmatmul.mubr.bf16.gmra.mxu1 %v1143_v52 }
 0x13a   :  { %952 = vmatprep.mubr.bf16.mxu1 %v1086_v16 }
 0x1e1   :  { %v890_v56 = vpop.f32.mrf.mxu1 }
 0x1e2   :  { %v371_v62 = vadd.f32 %v890_v56, %v758_v58 }
 0x1e3   :  { %v362_v57 = vpop.f32.mrf.mxu1 }
 0x1e4   :  { %v363_v60 = vadd.f32 %v758_v58, %v362_v57  ;;  %v427_v5 = vmax.f32 %v371_v62, 0.0 }
 0x1e5   :  { %v891_v59 = vpop.f32.mrf.mxu1 }
 0x1e6   :  { %v374_v61 = vadd.f32 %v891_v59, %v758_v58  ;;  %v425_v3 = vmax.f32 %v363_v60, 0.0 }
 0x1e7   :  { %v365_v63 = vpop.f32.mrf.mxu1 }
 0x1e8   :  { %v366_v0 = vadd.f32 %v758_v58, %v365_v63  ;;  %v428_v1 = vmax.f32 %v374_v61, 0.0 }
 0x1e9   :  { %v894_v2 = vpop.f32.mrf.mxu1 }
 0x1ea   :  { %v426_v4 = vmax.f32 %v366_v0, 0.0  ;;  %v442_v8 = vpack.c.bf16 %v428_v1, %v427_v5  ;;  %v387_v12 = vadd.f32 %v894_v2, %v758_v58 }
 0x1eb   :  { %v378_v6 = vpop.f32.mrf.mxu1 }
 0x1ec   :  { %v441_v7 = vpack.c.bf16 %v426_v4, %v425_v3  ;;  %v379_v10 = vadd.f32 %v758_v58, %v378_v6  ;;  %v431_v19 = vmax.f32 %v387_v12, 0.0 }
 0x1ed   :  { %v895_v9 = vpop.f32.mrf.mxu1 }
 0x1ee   :  { %v390_v11 = vadd.f32 %v895_v9, %v758_v58  ;;  %920 = vmatprep.mubr.bf16.mxu0 %v441_v7  ;;  %v429_v17 = vmax.f32 %v379_v10, 0.0 }
 0x1ef   :  { %v381_v13 = vpop.f32.mrf.mxu1  ;;  %921 = vmatmul.mubr.bf16.vlgmr.msra.gmra.mxu0 %v442_v8 }
 0x1f0   :  { %v382_v14 = vadd.f32 %v758_v58, %v381_v13  ;;  %v432_v15 = vmax.f32 %v390_v11, 0.0 }
 0x1f1   :  { %v898_v16 = vpop.f32.mrf.mxu1 }
 0x1f2   :  { %v430_v18 = vmax.f32 %v382_v14, 0.0  ;;  %v444_v22 = vpack.c.bf16 %v432_v15, %v431_v19  ;;  %v403_v26 = vadd.f32 %v898_v16, %v758_v58  ;;  %v775_v16 = vld [vmem:[%s1222_s5] ss:$0 sm:$0xff] }
 0x1f3   :  { %v394_v20 = vpop.f32.mrf.mxu1 }
 0x1f4   :  { %v443_v21 = vpack.c.bf16 %v430_v18, %v429_v17  ;;  %v395_v24 = vadd.f32 %v758_v58, %v394_v20  ;;  %v435_v33 = vmax.f32 %v403_v26, 0.0 }
 0x1f5   :  { %v899_v23 = vpop.f32.mrf.mxu1 }
 0x1f6   :  { %v406_v25 = vadd.f32 %v899_v23, %v758_v58  ;;  %924 = vmatprep.mubr.bf16.mxu0 %v443_v21  ;;  %v433_v31 = vmax.f32 %v395_v24, 0.0 }
 0x1f7   :  { %v397_v27 = vpop.f32.mrf.mxu1  ;;  %925 = vmatmul.mubr.bf16.gmra.mxu0 %v444_v22 }
 0x1f8   :  { %v398_v28 = vadd.f32 %v758_v58, %v397_v27  ;;  %v436_v29 = vmax.f32 %v406_v25, 0.0 }
 0x1f9   :  { %v902_v30 = vpop.f32.mrf.mxu1 }
 0x1fa   :  { %v434_v32 = vmax.f32 %v398_v28, 0.0  ;;  %v446_v36 = vpack.c.bf16 %v436_v29, %v435_v33  ;;  %v419_v40 = vadd.f32 %v902_v30, %v758_v58 }
 0x1fb   :  { %v410_v34 = vpop.f32.mrf.mxu1 }
 0x1fc   :  { %v445_v35 = vpack.c.bf16 %v434_v32, %v433_v31  ;;  %v411_v38 = vadd.f32 %v758_v58, %v410_v34  ;;  %v439_v53 = vmax.f32 %v419_v40, 0.0 }
 0x1fd   :  { %v903_v37 = vpop.f32.mrf.mxu1 }
 0x1fe   :  { %v422_v39 = vadd.f32 %v903_v37, %v758_v58  ;;  %928 = vmatprep.mubr.bf16.mxu0 %v445_v35  ;;  %v437_v44 = vmax.f32 %v411_v38, 0.0 }
 0x1ff   :  { %v413_v41 = vpop.f32.mrf.mxu1  ;;  %929 = vmatmul.mubr.bf16.gmra.mxu0 %v446_v36 }
 0x200   :  { %v414_v42 = vadd.f32 %v758_v58, %v413_v41  ;;  %v440_v43 = vmax.f32 %v422_v39, 0.0 }
 0x202   :  { %v438_v45 = vmax.f32 %v414_v42, 0.0  ;;  %v448_v55 = vpack.c.bf16 %v440_v43, %v439_v53 }
 0x204   :  { %v447_v54 = vpack.c.bf16 %v438_v45, %v437_v44 }
 0x206   :  { %932 = vmatprep.mubr.bf16.mxu0 %v447_v54 }
 0x207   :  { %933 = vmatmul.mubr.bf16.gmra.mxu0 %v448_v55 }
 0x2af   :  { %v922_v56 = vpop.f32.mrf.mxu0 }
 0x2b1   :  { %v547_v57 = vpop.f32.mrf.mxu0 }
 0x2b3   :  { %v923_v59 = vpop.f32.mrf.mxu0 }
 0x2b4   :  { %v611_v14 = vpack.c.bf16 %v923_v59, %v922_v56 }
 0x2b5   :  { %v550_v60 = vpop.f32.mrf.mxu0 }
 0x2b6   :  { %v610_v15 = vpack.c.bf16 %v550_v60, %v547_v57 }
 0x2b7   :  { %v926_v61 = vpop.f32.mrf.mxu0 }
 0x2b9   :  { %v563_v62 = vpop.f32.mrf.mxu0 }
 0x2bb   :  { %v927_v63 = vpop.f32.mrf.mxu0 }
 0x2bc   :  { %v613_v12 = vpack.c.bf16 %v927_v63, %v926_v61 }
 0x2bd   :  { %v566_v0 = vpop.f32.mrf.mxu0 }
 0x2be   :  { %v612_v13 = vpack.c.bf16 %v566_v0, %v563_v62 }
 0x2bf   :  { %v930_v1 = vpop.f32.mrf.mxu0 }
 0x2c1   :  { %v579_v2 = vpop.f32.mrf.mxu0 }
 0x2c3   :  { %v931_v3 = vpop.f32.mrf.mxu0 }
 0x2c4   :  { %v615_v10 = vpack.c.bf16 %v931_v3, %v930_v1 }
 0x2c5   :  { %v582_v58 = vpop.f32.mrf.mxu0 }
 0x2c6   :  { %v614_v11 = vpack.c.bf16 %v582_v58, %v579_v2 }
 0x2c7   :  { %v934_v4 = vpop.f32.mrf.mxu0 }
 0x2c9   :  { %v595_v5 = vpop.f32.mrf.mxu0 }
 0x2cb   :  { %v935_v6 = vpop.f32.mrf.mxu0 }
 0x2cc   :  { %v617_v7 = vpack.c.bf16 %v935_v6, %v934_v4 }
 0x2cd   :  { %v598_v8 = vpop.f32.mrf.mxu0 }
 0x2ce   :  { %v616_v9 = vpack.c.bf16 %v598_v8, %v595_v5  ;;  %936 = vmatprep.subr.bf16.mxu1 %v617_v7 }
 0x2cf   :  { %937 = vmatpush3.bf16.msra.mxu1 %v617_v7 }
 0x2d0   :  { %938 = vmatprep.subr.bf16.mxu1 %v616_v9 }
 0x2d3   :  { %939 = vmatpush3.bf16.msra.mxu1 %v616_v9 }
 0x2d4   :  { %940 = vmatprep.subr.bf16.mxu1 %v615_v10 }
 0x2d7   :  { %941 = vmatpush3.bf16.msra.mxu1 %v615_v10 }
 0x2d8   :  { %942 = vmatprep.subr.bf16.mxu1 %v614_v11 }
 0x2db   :  { %943 = vmatpush3.bf16.msra.mxu1 %v614_v11 }
 0x2dc   :  { %944 = vmatprep.subr.bf16.mxu1 %v613_v12 }
 0x2df   :  { %945 = vmatpush3.bf16.msra.mxu1 %v613_v12 }
 0x2e0   :  { %946 = vmatprep.subr.bf16.mxu1 %v612_v13 }
 0x2e3   :  { %947 = vmatpush3.bf16.msra.mxu1 %v612_v13 }
 0x2e4   :  { %948 = vmatprep.subr.bf16.mxu1 %v611_v14 }
 0x2e7   :  { %949 = vmatpush3.bf16.msra.mxu1 %v611_v14 }
 0x2e8   :  { %950 = vmatprep.subr.bf16.mxu1 %v610_v15 }
 0x2eb   :  { %951 = vmatpush3.bf16.msra.mxu1 %v610_v15 }
 0x2ee   :  { %953 = vmatmul.mubr.bf16.vlgmr.msra.gmra.mxu1 %v1107_v46 }
 0x2ef   :  { %956 = vmatprep.mubr.bf16.mxu1 %v1112_v47 }
 0x2f6   :  { %957 = vmatmul.mubr.bf16.gmra.mxu1 %v1119_v48 }
 0x2f7   :  { %960 = vmatprep.mubr.bf16.mxu1 %v1124_v49 }
 0x2fe   :  { %961 = vmatmul.mubr.bf16.gmra.mxu1 %v1131_v50 }
 0x2ff   :  { %964 = vmatprep.mubr.bf16.mxu1 %v1136_v51 }
 0x306   :  { %965 = vmatmul.mubr.bf16.gmra.mxu1 %v1143_v52 }
 0x3ae   :  { %v954_v17 = vpop.f32.mrf.mxu1 }
 0x3af   :  { %v668_v18 = vadd.f32 %v954_v17, %v775_v16 }
 0x3b0   :  { %v659_v19 = vpop.f32.mrf.mxu1 }
 0x3b1   :  { %724 = vst [vmem:[%s1223_s6 + $0x10] sm:$0xff] %v668_v18  ;;  %v660_v46 = vadd.f32 %v775_v16, %v659_v19 }
 0x3b2   :  { %v955_v47 = vpop.f32.mrf.mxu1 }
 0x3b3   :  { %722 = vst [vmem:[%s1223_s6] sm:$0xff] %v660_v46  ;;  %v671_v48 = vadd.f32 %v955_v47, %v775_v16 }
 0x3b4   :  { %v662_v49 = vpop.f32.mrf.mxu1 }
 0x3b5   :  { %725 = vst [vmem:[%s1223_s6 + $0x18] sm:$0xff] %v671_v48  ;;  %v663_v50 = vadd.f32 %v775_v16, %v662_v49 }
 0x3b6   :  { %v958_v51 = vpop.f32.mrf.mxu1 }
 0x3b7   :  { %723 = vst [vmem:[%s1223_s6 + $0x8] sm:$0xff] %v663_v50  ;;  %v684_v52 = vadd.f32 %v958_v51, %v775_v16 }
 0x3b8   :  { %v675_v20 = vpop.f32.mrf.mxu1 }
 0x3b9   :  { %728 = vst [vmem:[%s1223_s6 + $0x30] sm:$0xff] %v684_v52  ;;  %v676_v21 = vadd.f32 %v775_v16, %v675_v20 }
 0x3ba   :  { %v959_v22 = vpop.f32.mrf.mxu1 }
 0x3bb   :  { %726 = vst [vmem:[%s1223_s6 + $0x20] sm:$0xff] %v676_v21  ;;  %v687_v23 = vadd.f32 %v959_v22, %v775_v16 }
 0x3bc   :  { %v678_v24 = vpop.f32.mrf.mxu1 }
 0x3bd   :  { %729 = vst [vmem:[%s1223_s6 + $0x38] sm:$0xff] %v687_v23  ;;  %v679_v25 = vadd.f32 %v775_v16, %v678_v24 }
 0x3be   :  { %v962_v26 = vpop.f32.mrf.mxu1 }
 0x3bf   :  { %727 = vst [vmem:[%s1223_s6 + $0x28] sm:$0xff] %v679_v25  ;;  %v700_v27 = vadd.f32 %v962_v26, %v775_v16 }
 0x3c0   :  { %v691_v28 = vpop.f32.mrf.mxu1 }
 0x3c1   :  { %732 = vst [vmem:[%s1223_s6 + $0x50] sm:$0xff] %v700_v27  ;;  %v692_v29 = vadd.f32 %v775_v16, %v691_v28 }
 0x3c2   :  { %v963_v30 = vpop.f32.mrf.mxu1 }
 0x3c3   :  { %730 = vst [vmem:[%s1223_s6 + $0x40] sm:$0xff] %v692_v29  ;;  %v703_v31 = vadd.f32 %v963_v30, %v775_v16 }
 0x3c4   :  { %v694_v32 = vpop.f32.mrf.mxu1 }
 0x3c5   :  { %733 = vst [vmem:[%s1223_s6 + $0x58] sm:$0xff] %v703_v31  ;;  %v695_v33 = vadd.f32 %v775_v16, %v694_v32 }
 0x3c6   :  { %v966_v34 = vpop.f32.mrf.mxu1 }
 0x3c7   :  { %731 = vst [vmem:[%s1223_s6 + $0x48] sm:$0xff] %v695_v33  ;;  %v716_v35 = vadd.f32 %v966_v34, %v775_v16 }
 0x3c8   :  { %v707_v36 = vpop.f32.mrf.mxu1 }
 0x3c9   :  { %736 = vst [vmem:[%s1223_s6 + $0x70] sm:$0xff] %v716_v35  ;;  %v708_v37 = vadd.f32 %v775_v16, %v707_v36 }
 0x3ca   :  { %v967_v38 = vpop.f32.mrf.mxu1 }
 0x3cb   :  { %734 = vst [vmem:[%s1223_s6 + $0x60] sm:$0xff] %v708_v37  ;;  %v719_v39 = vadd.f32 %v967_v38, %v775_v16 }
 0x3cc   :  { %v710_v40 = vpop.f32.mrf.mxu1 }
 0x3cd   :  { %737 = vst [vmem:[%s1223_s6 + $0x78] sm:$0xff] %v719_v39  ;;  %v711_v41 = vadd.f32 %v775_v16, %v710_v40 }
 0x3cf   :  { %735 = vst [vmem:[%s1223_s6 + $0x68] sm:$0xff] %v711_v41 }

</bundles_post_ra>
